<compile_context>
chip_gen: v6e
topology: v6e:2x2x1
jax: 0.10.0
libtpu: 0.0.40
codegen_flags: <defaults>
</compile_context>

<pallas_src>
import jax
import jax.numpy as jnp
from jax.experimental import pallas as pl
from jax.experimental.pallas import tpu as pltpu


def mlp_kernel(s_ref, x_ref, v1_ref, b1_ref, v2_ref, b2_ref, o_ref):
    # s_ref: (2,) f32 in SMEM -> [g1/||V1||_F, g2/||V2||_F]
    s1 = s_ref[0]
    s2 = s_ref[1]

    # first weight-normed Linear (+ fused scalar scale) + bias + ReLU
    h = jnp.dot(x_ref[...], v1_ref[...], preferred_element_type=jnp.float32)
    h = h * s1 + b1_ref[...]
    h = jnp.maximum(h, 0.0)

    # TODO(synk): nn.Dropout is identity at inference; no pltpu.prng_* mask here.

    # second weight-normed Linear (+ fused scalar scale) + bias -> logits
    out = jnp.dot(h, v2_ref[...], preferred_element_type=jnp.float32)
    out = out * s2 + b2_ref[...]
    # TODO(synk): out_dim < 128 means masked lane stores; pack multiple heads to
    # a lane-dense output if this ever becomes the bottleneck.
    o_ref[...] = out.astype(o_ref.dtype)


def simple_classifier(x, v1, g1, b1, v2, g2, b2, *, block_m=128):
    """Forward pass of SimpleClassifier (inference).

    x  : (B, in_dim) float32
    v1 : (in_dim, hid_dim)  weight_norm direction tensor of first Linear
    g1 : ()                 weight_norm scalar gain of first Linear
    b1 : (1, hid_dim)
    v2 : (hid_dim, out_dim) weight_norm direction tensor of second Linear
    g2 : ()                 weight_norm scalar gain of second Linear
    b2 : (1, out_dim)
    returns logits (B, out_dim)
    """
    B, in_dim = x.shape
    hid_dim = v1.shape[1]
    out_dim = v2.shape[1]

    # weight_norm(dim=None): W_eff = g * V / ||V||_F.  Only the two scalars are
    # computed here; the scaling itself is fused into the kernel.
    s1 = g1 / jnp.sqrt(jnp.sum(v1 * v1))
    s2 = g2 / jnp.sqrt(jnp.sum(v2 * v2))
    scales = jnp.stack([s1, s2]).astype(jnp.float32)  # (2,) -> SMEM

    # batch tile: sublane-aligned (multiple of 8), capped at block_m
    tm = min(block_m, B)
    tm = max(8, ((tm + 7) // 8) * 8)
    grid_m = pl.cdiv(B, tm)
    b_pad = grid_m * tm
    if b_pad != B:
        x = jnp.pad(x, ((0, b_pad - B), (0, 0)))

    out = pl.pallas_call(
        mlp_kernel,
        out_shape=jax.ShapeDtypeStruct((b_pad, out_dim), x.dtype),
        grid=(grid_m,),
        in_specs=[
            # scalar weight_norm scales live in SMEM (whole array, no tiling)
            pl.BlockSpec(memory_space=pltpu.MemorySpace.SMEM),
            # x streams one batch tile per grid step
            pl.BlockSpec((tm, in_dim), lambda i: (i, 0)),
            # weights / biases: same block every step -> VMEM-resident
            pl.BlockSpec((in_dim, hid_dim), lambda i: (0, 0)),
            pl.BlockSpec((1, hid_dim), lambda i: (0, 0)),
            pl.BlockSpec((hid_dim, out_dim), lambda i: (0, 0)),
            pl.BlockSpec((1, out_dim), lambda i: (0, 0)),
        ],
        out_specs=pl.BlockSpec((tm, out_dim), lambda i: (i, 0)),
        compiler_params=pltpu.CompilerParams(
            # batch tiles are independent -> shard across TCs on v7x
            dimension_semantics=("parallel",),
        ),
    )(scales, x, v1, b1, v2, b2)

    return out[:B]


def reference(x, v1, g1, b1, v2, g2, b2):
    """Plain-JAX reference matching the PyTorch module (inference mode)."""
    w1 = (g1 / jnp.sqrt(jnp.sum(v1 * v1))) * v1
    w2 = (g2 / jnp.sqrt(jnp.sum(v2 * v2))) * v2
    h = jnp.maximum(x @ w1 + b1, 0.0)
    return h @ w2 + b2


if __name__ == "__main__":
    # Small but MXU-meaningful shapes: B=256 with TM=128 -> 2 grid steps.
    B, in_dim, hid_dim, out_dim = 256, 64, 128, 16

    key = jax.random.PRNGKey(0)
    k_x, k_v1, k_b1, k_v2, k_b2 = jax.random.split(key, 5)

    x = jax.random.normal(k_x, (B, in_dim), dtype=jnp.float32)

    # deterministic parameter init (PyTorch-style uniform bounds)
    bound1 = 1.0 / (in_dim ** 0.5)
    v1 = jax.random.uniform(k_v1, (in_dim, hid_dim), jnp.float32, -bound1, bound1)
    b1 = jax.random.uniform(k_b1, (1, hid_dim), jnp.float32, -bound1, bound1)
    # gains deliberately != ||V||_F so the fused weight_norm scale is exercised
    g1 = 1.7 * jnp.sqrt(jnp.sum(v1 * v1))

    bound2 = 1.0 / (hid_dim ** 0.5)
    v2 = jax.random.uniform(k_v2, (hid_dim, out_dim), jnp.float32, -bound2, bound2)
    b2 = jax.random.uniform(k_b2, (1, out_dim), jnp.float32, -bound2, bound2)
    g2 = 0.6 * jnp.sqrt(jnp.sum(v2 * v2))

    logits = simple_classifier(x, v1, g1, b1, v2, g2, b2)
    logits = jax.block_until_ready(logits)

    ref = reference(x, v1, g1, b1, v2, g2, b2)
    assert logits.shape == (B, out_dim)
    assert jnp.allclose(logits, ref, atol=1e-4, rtol=1e-4), (
        float(jnp.max(jnp.abs(logits - ref)))
    )

    print("KERNEL_OK")
</pallas_src>

<mosaic_0001>
module attributes {stable_mosaic.version = 11 : i64} {
  func.func @mlp_kernel(%arg0: i32, %arg1: memref<2xf32, #tpu.memory_space<smem>>, %arg2: memref<128x64xf32, #tpu.memory_space<vmem>>, %arg3: memref<64x128xf32, #tpu.memory_space<vmem>>, %arg4: memref<1x128xf32, #tpu.memory_space<vmem>>, %arg5: memref<128x16xf32, #tpu.memory_space<vmem>>, %arg6: memref<1x16xf32, #tpu.memory_space<vmem>>, %arg7: memref<128x16xf32, #tpu.memory_space<vmem>>) attributes {dimension_semantics = [#tpu.dimension_semantics<parallel>], iteration_bounds = array<i64: 2>, scalar_prefetch = 0 : i64, scratch_operands = 0 : i64, tpu.core_type = #tpu.core_type<tc>, window_params = [{transform_indices = @transform_0, window_bounds = array<i64: 2>}, {transform_indices = @transform_1, window_bounds = array<i64: 128, 64>}, {pipeline_mode = #tpu.pipeline_mode<synchronous>, transform_indices = @transform_2, window_bounds = array<i64: 64, 128>}, {pipeline_mode = #tpu.pipeline_mode<synchronous>, transform_indices = @transform_3, window_bounds = array<i64: 1, 128>}, {pipeline_mode = #tpu.pipeline_mode<synchronous>, transform_indices = @transform_4, window_bounds = array<i64: 128, 16>}, {pipeline_mode = #tpu.pipeline_mode<synchronous>, transform_indices = @transform_5, window_bounds = array<i64: 1, 16>}, {transform_indices = @transform_6, window_bounds = array<i64: 128, 16>}]} {
    %c0 = arith.constant 0 : index
    %0 = memref.load %arg1[%c0] : memref<2xf32, #tpu.memory_space<smem>>
    %c1 = arith.constant 1 : index
    %1 = memref.load %arg1[%c1] : memref<2xf32, #tpu.memory_space<smem>>
    %c0_0 = arith.constant 0 : index
    %c0_1 = arith.constant 0 : index
    %2 = vector.load %arg2[%c0_0, %c0_1] : memref<128x64xf32, #tpu.memory_space<vmem>>, vector<128x64xf32>
    %c0_2 = arith.constant 0 : index
    %c0_3 = arith.constant 0 : index
    %3 = vector.load %arg3[%c0_2, %c0_3] : memref<64x128xf32, #tpu.memory_space<vmem>>, vector<64x128xf32>
    %cst = arith.constant dense<0.000000e+00> : vector<128x128xf32>
    %4 = tpu.matmul %2, %3, %cst {dimension_numbers = #tpu.dot_dimension_numbers<[1], [0], [0], [1], [0, 0, 1, 1], [], []>} : vector<128x64xf32>, vector<64x128xf32>, vector<128x128xf32> -> vector<128x128xf32>
    %5 = vector.broadcast %0 : f32 to vector<128x128xf32>
    %6 = arith.mulf %4, %5 : vector<128x128xf32>
    %c0_4 = arith.constant 0 : index
    %c0_5 = arith.constant 0 : index
    %7 = vector.load %arg4[%c0_4, %c0_5] : memref<1x128xf32, #tpu.memory_space<vmem>>, vector<1x128xf32>
    %8 = vector.broadcast %7 : vector<1x128xf32> to vector<128x128xf32>
    %9 = arith.addf %6, %8 : vector<128x128xf32>
    %cst_6 = arith.constant 0.000000e+00 : f32
    %10 = vector.broadcast %cst_6 : f32 to vector<128x128xf32>
    %11 = arith.maximumf %9, %10 : vector<128x128xf32>
    %c0_7 = arith.constant 0 : index
    %c0_8 = arith.constant 0 : index
    %12 = vector.load %arg5[%c0_7, %c0_8] : memref<128x16xf32, #tpu.memory_space<vmem>>, vector<128x16xf32>
    %cst_9 = arith.constant dense<0.000000e+00> : vector<128x16xf32>
    %13 = tpu.matmul %11, %12, %cst_9 {dimension_numbers = #tpu.dot_dimension_numbers<[1], [0], [0], [1], [0, 0, 1, 1], [], []>} : vector<128x128xf32>, vector<128x16xf32>, vector<128x16xf32> -> vector<128x16xf32>
    %14 = vector.broadcast %1 : f32 to vector<128x16xf32>
    %15 = arith.mulf %13, %14 : vector<128x16xf32>
    %c0_10 = arith.constant 0 : index
    %c0_11 = arith.constant 0 : index
    %16 = vector.load %arg6[%c0_10, %c0_11] : memref<1x16xf32, #tpu.memory_space<vmem>>, vector<1x16xf32>
    %17 = vector.broadcast %16 : vector<1x16xf32> to vector<128x16xf32>
    %18 = arith.addf %15, %17 : vector<128x16xf32>
    %c0_12 = arith.constant 0 : index
    %c0_13 = arith.constant 0 : index
    %19 = vector.load %arg7[%c0_12, %c0_13] : memref<128x16xf32, #tpu.memory_space<vmem>>, vector<128x16xf32>
    tpu.vector_store %arg7[%c0_12, %c0_13], %18 {strides = array<i32>} : memref<128x16xf32, #tpu.memory_space<vmem>>, vector<128x16xf32>,
    return
  }
  func.func @transform_0(%arg0: i32) -> i32 {
    %c0_i32 = arith.constant 0 : i32
    %c0_i32_0 = arith.constant 0 : i32
    return %c0_i32 : i32
  }
  func.func @transform_1(%arg0: i32) -> (i32, i32) {
    %c0_i32 = arith.constant 0 : i32
    %c0_i32_0 = arith.constant 0 : i32
    return %arg0, %c0_i32 : i32, i32
  }
  func.func @transform_2(%arg0: i32) -> (i32, i32) {
    %c0_i32 = arith.constant 0 : i32
    %c0_i32_0 = arith.constant 0 : i32
    %c0_i32_1 = arith.constant 0 : i32
    return %c0_i32, %c0_i32_0 : i32, i32
  }
  func.func @transform_3(%arg0: i32) -> (i32, i32) {
    %c0_i32 = arith.constant 0 : i32
    %c0_i32_0 = arith.constant 0 : i32
    %c0_i32_1 = arith.constant 0 : i32
    return %c0_i32, %c0_i32_0 : i32, i32
  }
  func.func @transform_4(%arg0: i32) -> (i32, i32) {
    %c0_i32 = arith.constant 0 : i32
    %c0_i32_0 = arith.constant 0 : i32
    %c0_i32_1 = arith.constant 0 : i32
    return %c0_i32, %c0_i32_0 : i32, i32
  }
  func.func @transform_5(%arg0: i32) -> (i32, i32) {
    %c0_i32 = arith.constant 0 : i32
    %c0_i32_0 = arith.constant 0 : i32
    %c0_i32_1 = arith.constant 0 : i32
    return %c0_i32, %c0_i32_0 : i32, i32
  }
  func.func @transform_6(%arg0: i32) -> (i32, i32) {
    %c0_i32 = arith.constant 0 : i32
    %c0_i32_0 = arith.constant 0 : i32
    return %arg0, %c0_i32 : i32, i32
  }
}

</mosaic_0001>

<bundles_post_ra>
// kernel: tpu_custom_call.1
= control target key start
LH: loop header
LB: loop body
LE: loop exit
PB: predicated region body
PF: predicated region fallthrough
CT: control target
= control target key end

     0   :  { %11 = vsyncpa [#allocation3], 0  ;;  %s1129_s21 = smov 0   ;;  %s1392_s0 = inlined_call_operand.vmem [shape: f32[2], index: 0, kind: input, shape index: {}]   ;;  %s1393_s1 = inlined_call_operand.vmem [shape: f32[256,64], index: 1, kind: input, shape index: {}]   ;;  %s1394_s2 = inlined_call_operand.vmem [shape: f32[64,128], index: 2, kind: input, shape index: {}]   ;;  %s1395_s3 = inlined_call_operand.vmem [shape: f32[1,128], index: 3, kind: input, shape index: {}]   ;;  %s1396_s4 = inlined_call_operand.vmem [shape: f32[128,16], index: 4, kind: input, shape index: {}]   ;;  %s1397_s5 = inlined_call_operand.vmem [shape: f32[1,16], index: 5, kind: input, shape index: {}]   ;;  %s1398_s6 = inlined_call_operand.vmem [shape: f32[256,16], index: 6, kind: output, shape index: {}]  }
   0x1 LB: > { %s831_s22 = sadd.s32 4294967295, %s1091_s21   ;;  %p833_p0 = scmp.ge.s32.totalorder %s1091_s21, 1  ;;  %s1091_s21 = sphi %s1129_s21, %s17_s21  }
   0x2   : > { %p179_p1 = scmp.lt.s32.totalorder %s1091_s21, 3  ;;  %s192_s25 = sshll.u32 %s1392_s0, 4  ;;  %s193_s25 = int_to_ptr.vmem [resolvable:$true] %s192_s25 }
   0x3   : > { %p1144_p3 = scmp.eq.s32.totalorder %s831_s22, 0  ;;  %s1066_s28 = scalar_lea.vmem %s193_s25, 16 }
   0x4   : > { %p1140_p2 = pnand %p833_p0, %p179_p1  ;;  %p1067_p6 = scmp.ne.s32.totalorder %s193_s25, %s1066_s28 }
   0x5   : > { %p1074_p10 = scmp.lt.s32.totalorder %s193_s25, %s193_s25  ;;  %p1075_p11 = scmp.lt.s32.totalorder %s1066_s28, %s1066_s28 }
   0x6   : > { %p1051_p4 = pneg %p1140_p2 }
   0x7   : > { %p1076_p12 = por %p1075_p11, %p1074_p10 }
   0x8   : > { %p1052_p5 = pnand %p1144_p3, %p1051_p4 }
   0xa   : > { %p1068_p7 = pneg %p1052_p5 }
   0xc   : > { %p1069_p8 = pnand %p1068_p7, %p1067_p6 }
   0xe   : > { %p1070_p9 = pneg %p1069_p8 }
  0x10   : > { %p1077_p13 = pnand %p1076_p12, %p1070_p9 }
  0x12   : > { %1080 = shalt.err (!%p1077_p13)
}
  0x13   : > { %s1093_s29 = smov [#allocation2]   ;;  %226 = sbr.rel (%p1140_p2) target bundleno = 474 (0x1da), region = 44 }
  0x14   : > { %1054 = dma.vmem_to_smem (!%p1052_p5), %s193_s25, 16, %s1093_s29, [#allocation3]  }
  0x18   : > { %1086 = dma.done.wait (%p1144_p3), [#allocation3], 16  }
  0x19   : > { %1088 = vsyncadd (%p1144_p3), [#allocation3], 4294967280 }
  0x1a   : > { %232 = sfence }
  0x1b   : > { %v294_v0 = vld [vmem:[%s1394_s2 + $0x38] sm:$0xff]  ;;  %v293_v1 = vld [vmem:[%s1394_s2 + $0x30] sm:$0xff]  ;;  %s838_s10 = sshll.u32 %s831_s22, 4  ;;  %v292_v2 = vld [vmem:[%s1394_s2 + $0x28] sm:$0xff]  ;;  %vm295_vm0 = vcmask 523264   ;;  %s269_s16 = sld [smem:[#allocation2]] }
  0x1c   : > { %919 = vmatprep.subr.mxu0 %v294_v0  ;;  %p258_p0 = scmp.lt.s32.totalorder %s838_s10, 31  ;;  %v560_v3 = vld [vmem:[%s1396_s4 + $0x78] sm:$0xff]  ;;  %v291_v4 = vld [vmem:[%s1394_s2 + $0x20] sm:$0xff]  ;;  %v559_v5 = vld [vmem:[%s1396_s4 + $0x70] sm:$0xff]  ;;  %s842_s20 = sld [smem:[#allocation2 + $0x1]]  ;;  %vm746_vm1 = vcmask 130048  }
  0x1d   : > { %920 = vmatpush3.msra.mxu0 %v294_v0  ;;  %1015 = vmatprep.subr.mxu1 %v560_v3  ;;  %v290_v6 = vld [vmem:[%s1394_s2 + $0x18] sm:$0xff]  ;;  %v558_v7 = vld [vmem:[%s1396_s4 + $0x68] sm:$0xff]  ;;  %v289_v9 = vld [vmem:[%s1394_s2 + $0x10] sm:$0xff] }
  0x1e   : > { %921 = vmatprep.subr.mxu0 %v293_v1  ;;  %s1402_s10 = smov (!%p258_p0, %s838_s10), 31  ;;  %1031 = vmatpush3.msra.mxu1 %v560_v3  ;;  %v557_v10 = vld [vmem:[%s1396_s4 + $0x60] sm:$0xff]  ;;  %v288_v11 = vld [vmem:[%s1394_s2 + $0x8] sm:$0xff]  ;;  %v556_v12 = vld [vmem:[%s1396_s4 + $0x58] sm:$0xff] }
  0x1f   : > { %922 = vmatpush3.msra.mxu0 %v293_v1  ;;  %s839_s19 = sshll.u32 %s1402_s10, 3  ;;  %1016 = vmatprep.subr.mxu1 %v559_v5  ;;  %v287_v13 = vld [vmem:[%s1394_s2] sm:$0xff]  ;;  %v555_v14 = vld [vmem:[%s1396_s4 + $0x50] sm:$0xff]  ;;  %v554_v17 = vld [vmem:[%s1396_s4 + $0x48] sm:$0xff] }
  0x20   : > { %923 = vmatprep.subr.mxu0 %v292_v2  ;;  %s1187_s25 = scalar_lea.vmem %s1393_s1, %s839_s19  ;;  %1032 = vmatpush3.msra.mxu1 %v559_v5  ;;  %v553_v20 = vld [vmem:[%s1396_s4 + $0x40] sm:$0xff]  ;;  %v552_v23 = vld [vmem:[%s1396_s4 + $0x38] sm:$0xff]  ;;  %v551_v26 = vld [vmem:[%s1396_s4 + $0x30] sm:$0xff]  ;;  %s1324_s27 = scalar_lea.vmem %s1398_s6, %s839_s19 }
  0x21   : > { %924 = vmatpush3.msra.mxu0 %v292_v2  ;;  %v271_v8 = vld [vmem:[%s1187_s25] sm:$0xff]  ;;  %1017 = vmatprep.subr.mxu1 %v558_v7  ;;  %v272_v15 = vld [vmem:[%s1187_s25 + $0x8] sm:$0xff]  ;;  %v273_v16 = vld [vmem:[%s1187_s25 + $0x10] sm:$0xff]  ;;  %v1272_v40 = vstv %s269_s16 }
  0x22   : > { %925 = vmatprep.subr.mxu0 %v291_v4  ;;  %935 = vmatprep.mubr.msk.f32.mxu0 %vm295_vm0, %v271_v8  ;;  %v274_v18 = vld [vmem:[%s1187_s25 + $0x18] sm:$0xff]  ;;  %v275_v19 = vld [vmem:[%s1187_s25 + $0x20] sm:$0xff]  ;;  %v276_v21 = vld [vmem:[%s1187_s25 + $0x28] sm:$0xff] }
  0x23   : > { %926 = vmatpush3.msra.mxu0 %v291_v4  ;;  %1033 = vmatpush3.msra.mxu1 %v558_v7  ;;  %v277_v22 = vld [vmem:[%s1187_s25 + $0x30] sm:$0xff]  ;;  %v278_v24 = vld [vmem:[%s1187_s25 + $0x38] sm:$0xff]  ;;  %v279_v25 = vld [vmem:[%s1187_s25 + $0x40] sm:$0xff] }
  0x24   : > { %927 = vmatprep.subr.mxu0 %v290_v6  ;;  %1018 = vmatprep.subr.mxu1 %v557_v10  ;;  %v280_v27 = vld [vmem:[%s1187_s25 + $0x48] sm:$0xff]  ;;  %v281_v28 = vld [vmem:[%s1187_s25 + $0x50] sm:$0xff]  ;;  %v282_v30 = vld [vmem:[%s1187_s25 + $0x58] sm:$0xff] }
  0x25   : > { %928 = vmatpush3.msra.mxu0 %v290_v6  ;;  %1034 = vmatpush3.msra.mxu1 %v557_v10  ;;  %v550_v29 = vld [vmem:[%s1396_s4 + $0x28] sm:$0xff]  ;;  %v283_v31 = vld [vmem:[%s1187_s25 + $0x60] sm:$0xff]  ;;  %v285_v33 = vld [vmem:[%s1187_s25 + $0x70] sm:$0xff] }
  0x26   : > { %929 = vmatprep.subr.mxu0 %v289_v9  ;;  %1019 = vmatprep.subr.mxu1 %v556_v12  ;;  %v284_v32 = vld [vmem:[%s1187_s25 + $0x68] sm:$0xff]  ;;  %v286_v34 = vld [vmem:[%s1187_s25 + $0x78] sm:$0xff]  ;;  %v549_v35 = vld [vmem:[%s1396_s4 + $0x20] sm:$0xff] }
  0x27   : > { %930 = vmatpush3.msra.mxu0 %v289_v9  ;;  %1035 = vmatpush3.msra.mxu1 %v556_v12  ;;  %v548_v36 = vld [vmem:[%s1396_s4 + $0x18] sm:$0xff]  ;;  %v547_v37 = vld [vmem:[%s1396_s4 + $0x10] sm:$0xff]  ;;  %v546_v38 = vld [vmem:[%s1396_s4 + $0x8] sm:$0xff] }
  0x28   : > { %931 = vmatprep.subr.mxu0 %v288_v11  ;;  %1020 = vmatprep.subr.mxu1 %v555_v14  ;;  %v545_v39 = vld [vmem:[%s1396_s4] sm:$0xff] }
  0x29   : > { %932 = vmatpush3.msra.mxu0 %v288_v11  ;;  %1036 = vmatpush3.msra.mxu1 %v555_v14  ;;  %v1278_v43 = vld [vmem:[%s1395_s3] ss:$0 sm:$0xff] }
  0x2a   : > { %933 = vmatprep.subr.mxu0 %v287_v13  ;;  %1021 = vmatprep.subr.mxu1 %v554_v17 }
  0x2b   : > { %934 = vmatpush3.msra.mxu0 %v287_v13  ;;  %1037 = vmatpush3.msra.mxu1 %v554_v17 }
  0x2c   : > { %936 = vmatmul.mubr.msk.f32.vlgmr.msra.gmra.mxu0 %vm295_vm0, %v272_v15  ;;  %959 = vmatprep.subr.mxu0 %v560_v3 }
  0x2d   : > { %938 = vmatprep.mubr.msk.f32.mxu0 %vm295_vm0, %v273_v16  ;;  %960 = vmatpush3.msra.mxu0 %v560_v3 }
  0x2e   : > { %961 = vmatprep.subr.mxu0 %v559_v5  ;;  %1022 = vmatprep.subr.mxu1 %v553_v20 }
  0x2f   : > { %962 = vmatpush3.msra.mxu0 %v559_v5  ;;  %1038 = vmatpush3.msra.mxu1 %v553_v20 }
  0x30   : > { %939 = vmatmul.mubr.msk.f32.gmra.mxu0 %vm295_vm0, %v274_v18  ;;  %963 = vmatprep.subr.mxu0 %v558_v7 }
  0x31   : > { %941 = vmatprep.mubr.msk.f32.mxu0 %vm295_vm0, %v275_v19  ;;  %964 = vmatpush3.msra.mxu0 %v558_v7 }
  0x32   : > { %965 = vmatprep.subr.mxu0 %v557_v10  ;;  %1023 = vmatprep.subr.mxu1 %v552_v23 }
  0x33   : > { %966 = vmatpush3.msra.mxu0 %v557_v10  ;;  %1039 = vmatpush3.msra.mxu1 %v552_v23 }
  0x34   : > { %942 = vmatmul.mubr.msk.f32.gmra.mxu0 %vm295_vm0, %v276_v21  ;;  %967 = vmatprep.subr.mxu0 %v556_v12 }
  0x35   : > { %944 = vmatprep.mubr.msk.f32.mxu0 %vm295_vm0, %v277_v22  ;;  %968 = vmatpush3.msra.mxu0 %v556_v12 }
  0x36   : > { %969 = vmatprep.subr.mxu0 %v555_v14  ;;  %1024 = vmatprep.subr.mxu1 %v551_v26 }
  0x37   : > { %970 = vmatpush3.msra.mxu0 %v555_v14  ;;  %1040 = vmatpush3.msra.mxu1 %v551_v26 }
  0x38   : > { %945 = vmatmul.mubr.msk.f32.gmra.mxu0 %vm295_vm0, %v278_v24  ;;  %971 = vmatprep.subr.mxu0 %v554_v17 }
  0x39   : > { %947 = vmatprep.mubr.msk.f32.mxu0 %vm295_vm0, %v279_v25  ;;  %972 = vmatpush3.msra.mxu0 %v554_v17 }
  0x3a   : > { %973 = vmatprep.subr.mxu0 %v553_v20  ;;  %1025 = vmatprep.subr.mxu1 %v550_v29 }
  0x3b   : > { %974 = vmatpush3.msra.mxu0 %v553_v20  ;;  %1041 = vmatpush3.msra.mxu1 %v550_v29 }
  0x3c   : > { %948 = vmatmul.mubr.msk.f32.gmra.mxu0 %vm295_vm0, %v280_v27  ;;  %975 = vmatprep.subr.mxu0 %v552_v23 }
  0x3d   : > { %950 = vmatprep.mubr.msk.f32.mxu0 %vm295_vm0, %v281_v28  ;;  %976 = vmatpush3.msra.mxu0 %v552_v23 }
  0x3e   : > { %977 = vmatprep.subr.mxu0 %v551_v26  ;;  %1026 = vmatprep.subr.mxu1 %v549_v35 }
  0x3f   : > { %978 = vmatpush3.msra.mxu0 %v551_v26  ;;  %1042 = vmatpush3.msra.mxu1 %v549_v35 }
  0x40   : > { %951 = vmatmul.mubr.msk.f32.gmra.mxu0 %vm295_vm0, %v282_v30  ;;  %979 = vmatprep.subr.mxu0 %v550_v29 }
  0x41   : > { %953 = vmatprep.mubr.msk.f32.mxu0 %vm295_vm0, %v283_v31  ;;  %980 = vmatpush3.msra.mxu0 %v550_v29 }
  0x42   : > { %981 = vmatprep.subr.mxu0 %v549_v35  ;;  %1027 = vmatprep.subr.mxu1 %v548_v36 }
  0x43   : > { %982 = vmatpush3.msra.mxu0 %v549_v35  ;;  %1043 = vmatpush3.msra.mxu1 %v548_v36 }
  0x44   : > { %954 = vmatmul.mubr.msk.f32.gmra.mxu0 %vm295_vm0, %v284_v32  ;;  %983 = vmatprep.subr.mxu0 %v548_v36 }
  0x45   : > { %956 = vmatprep.mubr.msk.f32.mxu0 %vm295_vm0, %v285_v33  ;;  %984 = vmatpush3.msra.mxu0 %v548_v36 }
  0x46   : > { %985 = vmatprep.subr.mxu0 %v547_v37  ;;  %1028 = vmatprep.subr.mxu1 %v547_v37 }
  0x47   : > { %986 = vmatpush3.msra.mxu0 %v547_v37  ;;  %1044 = vmatpush3.msra.mxu1 %v547_v37 }
  0x48   : > { %957 = vmatmul.mubr.msk.f32.gmra.mxu0 %vm295_vm0, %v286_v34  ;;  %987 = vmatprep.subr.mxu0 %v546_v38 }
  0x49   : > { %1029 = vmatprep.subr.mxu1 %v546_v38  ;;  %988 = vmatpush3.msra.mxu0 %v546_v38 }
  0x4a   : > { %1045 = vmatpush3.msra.mxu1 %v546_v38  ;;  %989 = vmatprep.subr.mxu0 %v545_v39 }
  0x4b   : > { %1030 = vmatprep.subr.mxu1 %v545_v39  ;;  %990 = vmatpush3.msra.mxu0 %v545_v39 }
  0x4c   : > { %1046 = vmatpush3.msra.mxu1 %v545_v39 }
  0xec   : > { %v937_v41 = vpop.f32.mrf.mxu0 }
  0xed   : > { %v491_v42 = vmul.f32 %v937_v41, %v1272_v40 }
  0xee   : > { %v410_v44 = vpop.f32.mrf.mxu0 }
  0xef   : > { %v490_v45 = vmul.f32 %v1272_v40, %v410_v44  ;;  %v514_v46 = vadd.f32 %v1278_v43, %v491_v42  ;;  %v1311_v44 = vstv %s842_s20 }
  0xf0   : > { %v940_v47 = vpop.f32.mrf.mxu0 }
  0xf1   : > { %v513_v48 = vadd.f32 %v1278_v43, %v490_v45  ;;  %v493_v49 = vmul.f32 %v940_v47, %v1272_v40  ;;  %v530_v53 = vmax.f32 %v514_v46, 0.0  ;;  %v1316_v46 = vld [vmem:[%s1397_s5] ss:$0 sm:$0xff] }
  0xf2   : > { %v420_v50 = vpop.f32.mrf.mxu0 }
  0xf3   : > { %v529_v51 = vmax.f32 %v513_v48, 0.0  ;;  %v492_v52 = vmul.f32 %v1272_v40, %v420_v50  ;;  %v516_v54 = vadd.f32 %v1278_v43, %v493_v49 }
  0xf4   : > { %v943_v55 = vpop.f32.mrf.mxu0 }
  0xf5   : > { %v515_v56 = vadd.f32 %v1278_v43, %v492_v52  ;;  %v495_v57 = vmul.f32 %v943_v55, %v1272_v40  ;;  %991 = vmatprep.mubr.f32.mxu0 %v529_v51  ;;  %v532_v61 = vmax.f32 %v516_v54, 0.0 }
  0xf6   : > { %v430_v58 = vpop.f32.mrf.mxu0  ;;  %992 = vmatmul.mubr.f32.vlgmr.msra.gmra.mxu0 %v530_v53 }
  0xf7   : > { %v531_v59 = vmax.f32 %v515_v56, 0.0  ;;  %v494_v60 = vmul.f32 %v1272_v40, %v430_v58  ;;  %v518_v62 = vadd.f32 %v1278_v43, %v495_v57 }
  0xf8   : > { %v946_v63 = vpop.f32.mrf.mxu0 }
  0xf9   : > { %v497_v0 = vmul.f32 %v946_v63, %v1272_v40  ;;  %994 = vmatprep.mubr.f32.mxu0 %v531_v59  ;;  %v517_v1 = vadd.f32 %v1278_v43, %v494_v60  ;;  %v534_v5 = vmax.f32 %v518_v62, 0.0 }
  0xfa   : > { %v440_v2 = vpop.f32.mrf.mxu0  ;;  %995 = vmatmul.mubr.f32.gmra.mxu0 %v532_v61 }
  0xfb   : > { %v496_v3 = vmul.f32 %v1272_v40, %v440_v2  ;;  %v533_v4 = vmax.f32 %v517_v1, 0.0  ;;  %v520_v6 = vadd.f32 %v1278_v43, %v497_v0 }
  0xfc   : > { %v949_v7 = vpop.f32.mrf.mxu0 }
  0xfd   : > { %v519_v8 = vadd.f32 %v1278_v43, %v496_v3  ;;  %v499_v9 = vmul.f32 %v949_v7, %v1272_v40  ;;  %997 = vmatprep.mubr.f32.mxu1 %v533_v4  ;;  %v536_v13 = vmax.f32 %v520_v6, 0.0 }
  0xfe   : > { %v450_v10 = vpop.f32.mrf.mxu0  ;;  %998 = vmatmul.mubr.f32.vlgmr.msra.gmra.mxu1 %v534_v5 }
  0xff   : > { %v535_v11 = vmax.f32 %v519_v8, 0.0  ;;  %v498_v12 = vmul.f32 %v1272_v40, %v450_v10  ;;  %v522_v14 = vadd.f32 %v1278_v43, %v499_v9 }
 0x100   : > { %v952_v15 = vpop.f32.mrf.mxu0 }
 0x101   : > { %v521_v16 = vadd.f32 %v1278_v43, %v498_v12  ;;  %v501_v17 = vmul.f32 %v952_v15, %v1272_v40  ;;  %1000 = vmatprep.mubr.f32.mxu1 %v535_v11  ;;  %v538_v21 = vmax.f32 %v522_v14, 0.0 }
 0x102   : > { %v460_v18 = vpop.f32.mrf.mxu0  ;;  %1001 = vmatmul.mubr.f32.gmra.mxu1 %v536_v13 }
 0x103   : > { %v537_v19 = vmax.f32 %v521_v16, 0.0  ;;  %v500_v20 = vmul.f32 %v1272_v40, %v460_v18  ;;  %v524_v22 = vadd.f32 %v1278_v43, %v501_v17 }
 0x104   : > { %v955_v23 = vpop.f32.mrf.mxu0 }
 0x105   : > { %v523_v24 = vadd.f32 %v1278_v43, %v500_v20  ;;  %v503_v25 = vmul.f32 %v955_v23, %v1272_v40  ;;  %1003 = vmatprep.mubr.f32.mxu1 %v537_v19  ;;  %v540_v29 = vmax.f32 %v524_v22, 0.0 }
 0x106   : > { %v470_v26 = vpop.f32.mrf.mxu0  ;;  %1004 = vmatmul.mubr.f32.gmra.mxu1 %v538_v21 }
 0x107   : > { %v539_v27 = vmax.f32 %v523_v24, 0.0  ;;  %v502_v28 = vmul.f32 %v1272_v40, %v470_v26  ;;  %v526_v30 = vadd.f32 %v1278_v43, %v503_v25 }
 0x108   : > { %v958_v31 = vpop.f32.mrf.mxu0 }
 0x109   : > { %v525_v32 = vadd.f32 %v1278_v43, %v502_v28  ;;  %v505_v33 = vmul.f32 %v958_v31, %v1272_v40  ;;  %1006 = vmatprep.mubr.f32.mxu1 %v539_v27  ;;  %v542_v37 = vmax.f32 %v526_v30, 0.0 }
 0x10a   : > { %v480_v34 = vpop.f32.mrf.mxu0  ;;  %1007 = vmatmul.mubr.f32.gmra.mxu1 %v540_v29 }
 0x10b   : > { %v541_v35 = vmax.f32 %v525_v32, 0.0  ;;  %v504_v36 = vmul.f32 %v1272_v40, %v480_v34  ;;  %v528_v38 = vadd.f32 %v1278_v43, %v505_v33 }
 0x10d   : > { %v527_v39 = vadd.f32 %v1278_v43, %v504_v36  ;;  %1009 = vmatprep.mubr.f32.mxu1 %v541_v35  ;;  %v544_v42 = vmax.f32 %v528_v38, 0.0 }
 0x10e   : > { %1010 = vmatmul.mubr.f32.gmra.mxu1 %v542_v37 }
 0x10f   : > { %v543_v41 = vmax.f32 %v527_v39, 0.0 }
 0x111   : > { %1012 = vmatprep.mubr.f32.mxu1 %v543_v41 }
 0x112   : > { %1013 = vmatmul.mubr.f32.gmra.mxu1 %v544_v42 }
 0x1b6   : > { %v993_v45 = vpop.f32.mrf.mxu0 }
 0x1b7   : > { %v708_v40 = vmul.f32 %v993_v45, %v1311_v44 }
 0x1b8   : > { %v627_v43 = vpop.f32.mrf.mxu0 }
 0x1b9   : > { %v731_v47 = vadd.f32 %v1316_v46, %v708_v40  ;;  %v707_v48 = vmul.f32 %v1311_v44, %v627_v43 }
 0x1ba   : > { %v996_v49 = vpop.f32.mrf.mxu0 }
 0x1bb   : > { %748 = vst.msk [vmem:[%s1324_s27 + $0x8] sm:$0xff] %vm746_vm1, %v731_v47  ;;  %v730_v50 = vadd.f32 %v1316_v46, %v707_v48  ;;  %v710_v51 = vmul.f32 %v996_v49, %v1311_v44 }
 0x1bc   : > { %v637_v52 = vpop.f32.mrf.mxu0 }
 0x1bd   : > { %747 = vst.msk [vmem:[%s1324_s27] sm:$0xff] %vm746_vm1, %v730_v50  ;;  %v733_v53 = vadd.f32 %v1316_v46, %v710_v51  ;;  %v709_v54 = vmul.f32 %v1311_v44, %v637_v52 }
 0x1be   : > { %v999_v55 = vpop.f32.mrf.mxu1 }
 0x1bf   : > { %750 = vst.msk [vmem:[%s1324_s27 + $0x18] sm:$0xff] %vm746_vm1, %v733_v53  ;;  %v732_v56 = vadd.f32 %v1316_v46, %v709_v54  ;;  %v712_v57 = vmul.f32 %v999_v55, %v1311_v44 }
 0x1c0   : > { %v647_v58 = vpop.f32.mrf.mxu1 }
 0x1c1   : > { %749 = vst.msk [vmem:[%s1324_s27 + $0x10] sm:$0xff] %vm746_vm1, %v732_v56  ;;  %v735_v59 = vadd.f32 %v1316_v46, %v712_v57  ;;  %v711_v60 = vmul.f32 %v1311_v44, %v647_v58 }
 0x1c2   : > { %v1002_v61 = vpop.f32.mrf.mxu1 }
 0x1c3   : > { %752 = vst.msk [vmem:[%s1324_s27 + $0x28] sm:$0xff] %vm746_vm1, %v735_v59  ;;  %v734_v62 = vadd.f32 %v1316_v46, %v711_v60  ;;  %v714_v63 = vmul.f32 %v1002_v61, %v1311_v44 }
 0x1c4   : > { %v657_v0 = vpop.f32.mrf.mxu1 }
 0x1c5   : > { %751 = vst.msk [vmem:[%s1324_s27 + $0x20] sm:$0xff] %vm746_vm1, %v734_v62  ;;  %v737_v1 = vadd.f32 %v1316_v46, %v714_v63  ;;  %v713_v2 = vmul.f32 %v1311_v44, %v657_v0 }
 0x1c6   : > { %v1005_v3 = vpop.f32.mrf.mxu1 }
 0x1c7   : > { %754 = vst.msk [vmem:[%s1324_s27 + $0x38] sm:$0xff] %vm746_vm1, %v737_v1  ;;  %v736_v4 = vadd.f32 %v1316_v46, %v713_v2  ;;  %v716_v5 = vmul.f32 %v1005_v3, %v1311_v44 }
 0x1c8   : > { %v667_v6 = vpop.f32.mrf.mxu1 }
 0x1c9   : > { %753 = vst.msk [vmem:[%s1324_s27 + $0x30] sm:$0xff] %vm746_vm1, %v736_v4  ;;  %v739_v7 = vadd.f32 %v1316_v46, %v716_v5  ;;  %v715_v8 = vmul.f32 %v1311_v44, %v667_v6 }
 0x1ca   : > { %v1008_v9 = vpop.f32.mrf.mxu1 }
 0x1cb   : > { %756 = vst.msk [vmem:[%s1324_s27 + $0x48] sm:$0xff] %vm746_vm1, %v739_v7  ;;  %v738_v10 = vadd.f32 %v1316_v46, %v715_v8  ;;  %v718_v11 = vmul.f32 %v1008_v9, %v1311_v44 }
 0x1cc   : > { %v677_v12 = vpop.f32.mrf.mxu1 }
 0x1cd   : > { %755 = vst.msk [vmem:[%s1324_s27 + $0x40] sm:$0xff] %vm746_vm1, %v738_v10  ;;  %v741_v13 = vadd.f32 %v1316_v46, %v718_v11  ;;  %v717_v14 = vmul.f32 %v1311_v44, %v677_v12 }
 0x1ce   : > { %v1011_v15 = vpop.f32.mrf.mxu1 }
 0x1cf   : > { %758 = vst.msk [vmem:[%s1324_s27 + $0x58] sm:$0xff] %vm746_vm1, %v741_v13  ;;  %v740_v16 = vadd.f32 %v1316_v46, %v717_v14  ;;  %v720_v17 = vmul.f32 %v1011_v15, %v1311_v44 }
 0x1d0   : > { %v687_v18 = vpop.f32.mrf.mxu1 }
 0x1d1   : > { %757 = vst.msk [vmem:[%s1324_s27 + $0x50] sm:$0xff] %vm746_vm1, %v740_v16  ;;  %v743_v19 = vadd.f32 %v1316_v46, %v720_v17  ;;  %v719_v20 = vmul.f32 %v1311_v44, %v687_v18 }
 0x1d2   : > { %v1014_v21 = vpop.f32.mrf.mxu1 }
 0x1d3   : > { %760 = vst.msk [vmem:[%s1324_s27 + $0x68] sm:$0xff] %vm746_vm1, %v743_v19  ;;  %v742_v22 = vadd.f32 %v1316_v46, %v719_v20  ;;  %v722_v23 = vmul.f32 %v1014_v21, %v1311_v44 }
 0x1d4   : > { %v697_v24 = vpop.f32.mrf.mxu1 }
 0x1d5   : > { %759 = vst.msk [vmem:[%s1324_s27 + $0x60] sm:$0xff] %vm746_vm1, %v742_v22  ;;  %v745_v25 = vadd.f32 %v1316_v46, %v722_v23  ;;  %v721_v26 = vmul.f32 %v1311_v44, %v697_v24 }
 0x1d7   : > { %762 = vst.msk [vmem:[%s1324_s27 + $0x78] sm:$0xff] %vm746_vm1, %v745_v25  ;;  %v744_v27 = vadd.f32 %v1316_v46, %v721_v26 }
 0x1d9   : > { %761 = vst.msk [vmem:[%s1324_s27 + $0x70] sm:$0xff] %vm746_vm1, %v744_v27 }
 0x1da PF: > { %s17_s21 = sadd.s32 1, %s1091_s21  }
 0x1db   : > { %p14_p1 = scmp.ge.s32.totalorder %s17_s21, 4  }
 0x1dd   :  { %16 = sbr.rel (!%p14_p1) target bundleno = 1 (0x1), region = 79 }
 0x1e2   :  { %785 = vsyncpa [#allocation3], 1 }
 0x1e3   :  { %787 = vsyncpa [#allocation3 + $0x1], 1 }

</bundles_post_ra>
